<compile_context>
chip_gen: v7x
topology: tpu7x:2x2x1
jax: 0.10.0
libtpu: 0.0.40
codegen_flags: <defaults>
</compile_context>

<pallas_src>
import jax
import jax.numpy as jnp
from jax.experimental import pallas as pl
from jax.experimental.pallas import tpu as pltpu

D_IN, H1, H2, D_OUT = 784, 128, 256, 10
D_IN_PAD = 896    # 7 * 128 : K of the first matmul is lane/MXU aligned
D_OUT_PAD = 128   # lane-dense output block; padded columns are exact zeros


def _round_up(x, m):
    return (x + m - 1) // m * m


def mlp_kernel(x_ref, w1_ref, b1_ref, w2_ref, b2_ref, w3_ref, b3_ref, o_ref):
    # hidden1 + ReLU : (TB,896)bf16 @ (896,128)bf16 -> (TB,128) f32 accum
    h1 = jnp.dot(x_ref[...], w1_ref[...], preferred_element_type=jnp.float32)
    h1 = jnp.maximum(h1 + b1_ref[...], 0.0)

    # hidden2 + ReLU : (TB,128) @ (128,256) -> (TB,256)
    h2 = jnp.dot(h1.astype(jnp.bfloat16), w2_ref[...],
                 preferred_element_type=jnp.float32)
    h2 = jnp.maximum(h2 + b2_ref[...], 0.0)

    # out (padded to 128 lanes) : (TB,256) @ (256,128) -> (TB,128)
    y = jnp.dot(h2.astype(jnp.bfloat16), w3_ref[...],
                preferred_element_type=jnp.float32)
    o_ref[...] = (y + b3_ref[...]).astype(o_ref.dtype)


def prepare_params(params_f32):
    """Pad weights to lane-aligned shapes and cast matmul operands to bf16."""
    w1, b1, w2, b2, w3, b3 = params_f32
    w1p = jnp.zeros((D_IN_PAD, H1), jnp.float32).at[:D_IN, :].set(w1)
    w3p = jnp.zeros((H2, D_OUT_PAD), jnp.float32).at[:, :D_OUT].set(w3)
    b3p = jnp.zeros((1, D_OUT_PAD), jnp.float32).at[:, :D_OUT].set(
        b3.reshape(1, D_OUT))
    return (
        w1p.astype(jnp.bfloat16), b1.reshape(1, H1).astype(jnp.float32),
        w2.astype(jnp.bfloat16), b2.reshape(1, H2).astype(jnp.float32),
        w3p.astype(jnp.bfloat16), b3p,
    )


@jax.jit
def mnist_nn_forward(x, prepared_params):
    w1, b1, w2, b2, w3, b3 = prepared_params
    B = x.shape[0]
    # Batch tile: fill the MXU (256 rows) for large batches; round small batches to 8.
    TB = 256 if B >= 256 else _round_up(B, 8)
    Bp = _round_up(B, TB)
    n_tiles = Bp // TB

    # Zero-pad batch rows and the 784->896 feature columns, then cast to bf16.
    xp = jnp.zeros((Bp, D_IN_PAD), jnp.float32)
    xp = xp.at[:B, :D_IN].set(x).astype(jnp.bfloat16)

    flops = 2 * Bp * (D_IN_PAD * H1 + H1 * H2 + H2 * D_OUT_PAD)
    bytes_accessed = (
        Bp * D_IN_PAD * 2                                            # x (bf16)
        + (D_IN_PAD * H1 + H1 * H2 + H2 * D_OUT_PAD) * 2             # weights (bf16)
        + (H1 + H2 + D_OUT_PAD) * 4                                  # biases (f32)
        + Bp * D_OUT_PAD * 4                                         # out (f32)
    )

    resident = lambda shape: pl.BlockSpec(shape, lambda i: (0, 0))

    out_padded = pl.pallas_call(
        mlp_kernel,
        out_shape=jax.ShapeDtypeStruct((Bp, D_OUT_PAD), jnp.float32),
        grid=(n_tiles,),
        in_specs=[
            pl.BlockSpec((TB, D_IN_PAD), lambda i: (i, 0)),   # x: tiled over batch
            resident((D_IN_PAD, H1)), resident((1, H1)),       # weights/biases: DMA'd once
            resident((H1, H2)), resident((1, H2)),
            resident((H2, D_OUT_PAD)), resident((1, D_OUT_PAD)),
        ],
        out_specs=pl.BlockSpec((TB, D_OUT_PAD), lambda i: (i, 0)),
        compiler_params=pltpu.CompilerParams(
            dimension_semantics=("parallel",),
        ),
        cost_estimate=pl.CostEstimate(
            flops=flops, transcendentals=0, bytes_accessed=bytes_accessed),
    )(xp, w1, b1, w2, b2, w3, b3)

    return out_padded[:B, :D_OUT]


def init_params(key):
    # Deterministic init mimicking nn.Linear's U(-1/sqrt(fan_in), 1/sqrt(fan_in)).
    ks = jax.random.split(key, 6)

    def linear(kw, kb, fan_in, fan_out):
        bound = 1.0 / jnp.sqrt(fan_in)
        w = jax.random.uniform(kw, (fan_in, fan_out), jnp.float32, -bound, bound)
        b = jax.random.uniform(kb, (fan_out,), jnp.float32, -bound, bound)
        return w, b

    w1, b1 = linear(ks[0], ks[1], D_IN, H1)
    w2, b2 = linear(ks[2], ks[3], H1, H2)
    w3, b3 = linear(ks[4], ks[5], H2, D_OUT)
    return (w1, b1, w2, b2, w3, b3)


def reference_bf16(x, params_f32):
    # Mirrors the kernel math exactly (bf16 operands, f32 accumulation).
    w1, b1, w2, b2, w3, b3 = params_f32
    h1 = jnp.dot(x.astype(jnp.bfloat16), w1.astype(jnp.bfloat16),
                 preferred_element_type=jnp.float32) + b1
    h1 = jnp.maximum(h1, 0.0)
    h2 = jnp.dot(h1.astype(jnp.bfloat16), w2.astype(jnp.bfloat16),
                 preferred_element_type=jnp.float32) + b2
    h2 = jnp.maximum(h2, 0.0)
    return jnp.dot(h2.astype(jnp.bfloat16), w3.astype(jnp.bfloat16),
                   preferred_element_type=jnp.float32) + b3


if __name__ == "__main__":
    key = jax.random.PRNGKey(0)
    kx, kp = jax.random.split(key)

    B = 8  # small deterministic test batch
    x = jax.random.normal(kx, (B, D_IN), jnp.float32)
    params = init_params(kp)
    prepared = prepare_params(params)

    out = mnist_nn_forward(x, prepared)
    out = jax.block_until_ready(out)
    assert out.shape == (B, D_OUT)

    # Tight check against a reference that mirrors the kernel's bf16/f32 math.
    ref_b = reference_bf16(x, params)
    assert jnp.allclose(out, ref_b, atol=2e-3, rtol=2e-3), "mismatch vs bf16 reference"

    # Loose sanity check against the full-f32 PyTorch semantics.
    w1, b1, w2, b2, w3, b3 = params
    ref_f = jnp.maximum(x @ w1 + b1, 0.0)
    ref_f = jnp.maximum(ref_f @ w2 + b2, 0.0)
    ref_f = ref_f @ w3 + b3
    assert jnp.allclose(out, ref_f, atol=5e-2, rtol=5e-2), "mismatch vs f32 reference"

    print("KERNEL_OK")
</pallas_src>

<mosaic_0001>
module attributes {stable_mosaic.version = 11 : i64} {
  func.func @mlp_kernel(%arg0: i32, %arg1: memref<8x896xbf16, #tpu.memory_space<vmem>>, %arg2: memref<896x128xbf16, #tpu.memory_space<vmem>>, %arg3: memref<1x128xf32, #tpu.memory_space<vmem>>, %arg4: memref<128x256xbf16, #tpu.memory_space<vmem>>, %arg5: memref<1x256xf32, #tpu.memory_space<vmem>>, %arg6: memref<256x128xbf16, #tpu.memory_space<vmem>>, %arg7: memref<1x128xf32, #tpu.memory_space<vmem>>, %arg8: memref<8x128xf32, #tpu.memory_space<vmem>>) attributes {dimension_semantics = [#tpu.dimension_semantics<parallel>], iteration_bounds = array<i64: 1>, scalar_prefetch = 0 : i64, scratch_operands = 0 : i64, tpu.core_type = #tpu.core_type<tc>, window_params = [{transform_indices = @transform_0, window_bounds = array<i64: 8, 896>}, {pipeline_mode = #tpu.pipeline_mode<synchronous>, transform_indices = @transform_1, window_bounds = array<i64: 896, 128>}, {pipeline_mode = #tpu.pipeline_mode<synchronous>, transform_indices = @transform_2, window_bounds = array<i64: 1, 128>}, {pipeline_mode = #tpu.pipeline_mode<synchronous>, transform_indices = @transform_3, window_bounds = array<i64: 128, 256>}, {pipeline_mode = #tpu.pipeline_mode<synchronous>, transform_indices = @transform_4, window_bounds = array<i64: 1, 256>}, {pipeline_mode = #tpu.pipeline_mode<synchronous>, transform_indices = @transform_5, window_bounds = array<i64: 256, 128>}, {pipeline_mode = #tpu.pipeline_mode<synchronous>, transform_indices = @transform_6, window_bounds = array<i64: 1, 128>}, {transform_indices = @transform_7, window_bounds = array<i64: 8, 128>}]} {
    %c0 = arith.constant 0 : index
    %c0_0 = arith.constant 0 : index
    %0 = vector.load %arg1[%c0, %c0_0] : memref<8x896xbf16, #tpu.memory_space<vmem>>, vector<8x896xbf16>
    %c0_1 = arith.constant 0 : index
    %c0_2 = arith.constant 0 : index
    %1 = vector.load %arg2[%c0_1, %c0_2] : memref<896x128xbf16, #tpu.memory_space<vmem>>, vector<896x128xbf16>
    %cst = arith.constant dense<0.000000e+00> : vector<8x128xf32>
    %2 = tpu.matmul %0, %1, %cst {dimension_numbers = #tpu.dot_dimension_numbers<[1], [0], [0], [1], [0, 0, 1, 1], [], []>} : vector<8x896xbf16>, vector<896x128xbf16>, vector<8x128xf32> -> vector<8x128xf32>
    %c0_3 = arith.constant 0 : index
    %c0_4 = arith.constant 0 : index
    %3 = vector.load %arg3[%c0_3, %c0_4] : memref<1x128xf32, #tpu.memory_space<vmem>>, vector<1x128xf32>
    %4 = vector.broadcast %3 : vector<1x128xf32> to vector<8x128xf32>
    %5 = arith.addf %2, %4 : vector<8x128xf32>
    %cst_5 = arith.constant 0.000000e+00 : f32
    %6 = vector.broadcast %cst_5 : f32 to vector<8x128xf32>
    %7 = arith.maximumf %5, %6 : vector<8x128xf32>
    %8 = arith.truncf %7 : vector<8x128xf32> to vector<8x128xbf16>
    %c0_6 = arith.constant 0 : index
    %c0_7 = arith.constant 0 : index
    %9 = vector.load %arg4[%c0_6, %c0_7] : memref<128x256xbf16, #tpu.memory_space<vmem>>, vector<128x256xbf16>
    %cst_8 = arith.constant dense<0.000000e+00> : vector<8x256xf32>
    %10 = tpu.matmul %8, %9, %cst_8 {dimension_numbers = #tpu.dot_dimension_numbers<[1], [0], [0], [1], [0, 0, 1, 1], [], []>} : vector<8x128xbf16>, vector<128x256xbf16>, vector<8x256xf32> -> vector<8x256xf32>
    %c0_9 = arith.constant 0 : index
    %c0_10 = arith.constant 0 : index
    %11 = vector.load %arg5[%c0_9, %c0_10] : memref<1x256xf32, #tpu.memory_space<vmem>>, vector<1x256xf32>
    %12 = vector.broadcast %11 : vector<1x256xf32> to vector<8x256xf32>
    %13 = arith.addf %10, %12 : vector<8x256xf32>
    %cst_11 = arith.constant 0.000000e+00 : f32
    %14 = vector.broadcast %cst_11 : f32 to vector<8x256xf32>
    %15 = arith.maximumf %13, %14 : vector<8x256xf32>
    %16 = arith.truncf %15 : vector<8x256xf32> to vector<8x256xbf16>
    %c0_12 = arith.constant 0 : index
    %c0_13 = arith.constant 0 : index
    %17 = vector.load %arg6[%c0_12, %c0_13] : memref<256x128xbf16, #tpu.memory_space<vmem>>, vector<256x128xbf16>
    %cst_14 = arith.constant dense<0.000000e+00> : vector<8x128xf32>
    %18 = tpu.matmul %16, %17, %cst_14 {dimension_numbers = #tpu.dot_dimension_numbers<[1], [0], [0], [1], [0, 0, 1, 1], [], []>} : vector<8x256xbf16>, vector<256x128xbf16>, vector<8x128xf32> -> vector<8x128xf32>
    %c0_15 = arith.constant 0 : index
    %c0_16 = arith.constant 0 : index
    %19 = vector.load %arg7[%c0_15, %c0_16] : memref<1x128xf32, #tpu.memory_space<vmem>>, vector<1x128xf32>
    %20 = vector.broadcast %19 : vector<1x128xf32> to vector<8x128xf32>
    %21 = arith.addf %18, %20 : vector<8x128xf32>
    %c0_17 = arith.constant 0 : index
    %c0_18 = arith.constant 0 : index
    %22 = vector.load %arg8[%c0_17, %c0_18] : memref<8x128xf32, #tpu.memory_space<vmem>>, vector<8x128xf32>
    tpu.vector_store %arg8[%c0_17, %c0_18], %21 {strides = array<i32>} : memref<8x128xf32, #tpu.memory_space<vmem>>, vector<8x128xf32>,
    return
  }
  func.func @transform_0(%arg0: i32) -> (i32, i32) {
    %c0_i32 = arith.constant 0 : i32
    %c0_i32_0 = arith.constant 0 : i32
    return %arg0, %c0_i32 : i32, i32
  }
  func.func @transform_1(%arg0: i32) -> (i32, i32) {
    %c0_i32 = arith.constant 0 : i32
    %c0_i32_0 = arith.constant 0 : i32
    %c0_i32_1 = arith.constant 0 : i32
    return %c0_i32, %c0_i32_0 : i32, i32
  }
  func.func @transform_2(%arg0: i32) -> (i32, i32) {
    %c0_i32 = arith.constant 0 : i32
    %c0_i32_0 = arith.constant 0 : i32
    %c0_i32_1 = arith.constant 0 : i32
    return %c0_i32, %c0_i32_0 : i32, i32
  }
  func.func @transform_3(%arg0: i32) -> (i32, i32) {
    %c0_i32 = arith.constant 0 : i32
    %c0_i32_0 = arith.constant 0 : i32
    %c0_i32_1 = arith.constant 0 : i32
    return %c0_i32, %c0_i32_0 : i32, i32
  }
  func.func @transform_4(%arg0: i32) -> (i32, i32) {
    %c0_i32 = arith.constant 0 : i32
    %c0_i32_0 = arith.constant 0 : i32
    %c0_i32_1 = arith.constant 0 : i32
    return %c0_i32, %c0_i32_0 : i32, i32
  }
  func.func @transform_5(%arg0: i32) -> (i32, i32) {
    %c0_i32 = arith.constant 0 : i32
    %c0_i32_0 = arith.constant 0 : i32
    %c0_i32_1 = arith.constant 0 : i32
    return %c0_i32, %c0_i32_0 : i32, i32
  }
  func.func @transform_6(%arg0: i32) -> (i32, i32) {
    %c0_i32 = arith.constant 0 : i32
    %c0_i32_0 = arith.constant 0 : i32
    %c0_i32_1 = arith.constant 0 : i32
    return %c0_i32, %c0_i32_0 : i32, i32
  }
  func.func @transform_7(%arg0: i32) -> (i32, i32) {
    %c0_i32 = arith.constant 0 : i32
    %c0_i32_0 = arith.constant 0 : i32
    return %arg0, %c0_i32 : i32, i32
  }
}

</mosaic_0001>

<bundles_post_ra>
// kernel: mnist_nn_forward.1
= control target key start
LH: loop header
LB: loop body
LE: loop exit
PB: predicated region body
PF: predicated region fallthrough
CT: control target
= control target key end

     0   :  { %12 = vsyncpa [#allocation3], 0  ;;  %s1597_s0 = inlined_call_operand.vmem [shape: bf16[8,896], index: 0, kind: input, shape index: {}]   ;;  %s1598_s1 = inlined_call_operand.hbm [shape: bf16[896,128], index: 1, kind: input, shape index: {}]   ;;  %s1599_s2 = inlined_call_operand.vmem [shape: f32[1,128], index: 2, kind: input, shape index: {}]   ;;  %s1600_s3 = inlined_call_operand.vmem [shape: bf16[128,256], index: 3, kind: input, shape index: {}]   ;;  %s1601_s4 = inlined_call_operand.vmem [shape: f32[1,256], index: 4, kind: input, shape index: {}]   ;;  %s1602_s5 = inlined_call_operand.hbm [shape: bf16[256,128], index: 5, kind: input, shape index: {}]   ;;  %s1603_s6 = inlined_call_operand.vmem [shape: f32[1,128], index: 6, kind: input, shape index: {}]   ;;  %s1604_s7 = inlined_call_operand.hbm [shape: f32[8,128], index: 7, kind: output, shape index: {}]  }
   0x1   :  { %13 = vsyncpa [#allocation6], 0 }
   0x2   :  { %14 = vsyncpa [#allocation4], 0  ;;  %s1444_s24 = smov [#allocation2]   ;;  %s1372_s28 = scalar_lea.hbm %s1598_s1, 7168 }
   0x3   :  { %s22_s25 = sshll.u32 %s1444_s24, 4  ;;  %p1373_p0 = scmp.ne.s32.totalorder %s1598_s1, %s1372_s28  ;;  %s23_s25 = int_to_ptr.vmem [resolvable:$true] %s22_s25 }
   0x4   :  { %p1376_p1 = scmp.lt.u32.totalorder %s1372_s28, %s1598_s1 }
   0x6   :  { %p1378_p2 = pnand %p1376_p1, %p1373_p0 }
   0x8   :  { %1381 = shalt.err (!%p1378_p2)
}
   0x9   :  { %s1382_s10 = scalar_lea.vmem %s23_s25, 7168  ;;  %p1387_p4 = scmp.lt.s32.totalorder %s23_s25, %s23_s25 }
   0xa   :  { %p1383_p3 = scmp.ne.s32.totalorder %s23_s25, %s1382_s10  ;;  %p1388_p5 = scmp.lt.s32.totalorder %s1382_s10, %s1382_s10 }
   0xc   :  { %p1389_p6 = por %p1388_p5, %p1387_p4 }
   0xe   :  { %p1390_p7 = pnand %p1389_p6, %p1383_p3 }
  0x10   :  { %1393 = shalt.err (!%p1390_p7)
}
  0x11   :  { %s1445_s11 = smov 64   ;;  %s1446_s12 = smov 4  }
  0x12   :  { %28 = dma.hbm_to_vmem [thread:$0]  %s1598_s1, 7168, %s23_s25, [#allocation3], %s1445_s11, %s1445_s11, %s1446_s12  }
  0x13   :  { %s1447_s15 = smov [#allocation5]   ;;  %s1394_s19 = scalar_lea.hbm %s1602_s5, 2048 }
  0x14   :  { %s40_s16 = sshll.u32 %s1447_s15, 4  ;;  %p1395_p8 = scmp.ne.s32.totalorder %s1602_s5, %s1394_s19  ;;  %s41_s16 = int_to_ptr.vmem [resolvable:$true] %s40_s16 }
  0x15   :  { %p1398_p9 = scmp.lt.u32.totalorder %s1394_s19, %s1602_s5 }
  0x17   :  { %p1400_p10 = pnand %p1398_p9, %p1395_p8 }
  0x19   :  { %1403 = shalt.err (!%p1400_p10)
}
  0x1a   :  { %s1404_s24 = scalar_lea.vmem %s41_s16, 2048  ;;  %p1409_p12 = scmp.lt.s32.totalorder %s41_s16, %s41_s16 }
  0x1b   :  { %p1405_p11 = scmp.ne.s32.totalorder %s41_s16, %s1404_s24  ;;  %p1410_p13 = scmp.lt.s32.totalorder %s1404_s24, %s1404_s24 }
  0x1d   :  { %p1411_p0 = por %p1410_p13, %p1409_p12 }
  0x1f   :  { %p1412_p1 = pnand %p1411_p0, %p1405_p11 }
  0x21   :  { %1415 = shalt.err (!%p1412_p1)
}
  0x22   :  { %46 = dma.hbm_to_vmem [thread:$0]  %s1602_s5, 2048, %s41_s16, [#allocation6], %s1445_s11, %s1445_s11, %s1446_s12  }
  0x23   :  { %1438 = dma.done.wait [#allocation3], 7168  }
  0x24   :  { %1439 = vsyncadd [#allocation3], 4294960128 }
  0x25   :  { %1440 = dma.done.wait [#allocation6], 2048  }
  0x26   :  { %1441 = vsyncadd [#allocation6], 4294965248  ;;  %v1269_v0 = vld [vmem:[#allocation2 + $0x40] sm:$0xff]   ;;  %v1273_v4 = vld [vmem:[#allocation2 + $0x48] sm:$0xff]   ;;  %v1448_v42 = vmov 0.0   ;;  %vm1449_vm0 = vmmov 0  }
  0x27   :  { %v1270_v1 = vld [vmem:[#allocation2] sm:$0xff]   ;;  %1144 = vmatprep.subr.bf16.mxu0 %v1269_v0  ;;  %v1274_v5 = vld [vmem:[#allocation2 + $0x8] sm:$0xff]   ;;  %v1277_v8 = vld [vmem:[#allocation2 + $0x50] sm:$0xff]  }
  0x28   :  { %v1271_v2 = vld [vmem:[#allocation2 + $0xc0] sm:$0xff]   ;;  %1145 = vmatpush3.bf16.msra.mxu0 %v1270_v1  ;;  %v1275_v6 = vld [vmem:[#allocation2 + $0xc8] sm:$0xff]   ;;  %v1278_v9 = vld [vmem:[#allocation2 + $0x10] sm:$0xff]  }
  0x29   :  { %v1272_v3 = vld [vmem:[#allocation2 + $0x80] sm:$0xff]   ;;  %1166 = vmatprep.subr.bf16.mxu1 %v1271_v2  ;;  %1146 = vmatprep.subr.bf16.mxu0 %v1273_v4  ;;  %v1276_v7 = vld [vmem:[#allocation2 + $0x88] sm:$0xff]   ;;  %v1279_v10 = vld [vmem:[#allocation2 + $0xd0] sm:$0xff]  }
  0x2a   :  { %1167 = vmatpush3.bf16.msra.mxu1 %v1272_v3  ;;  %v1280_v11 = vld [vmem:[#allocation2 + $0x90] sm:$0xff]   ;;  %v1281_v12 = vld [vmem:[#allocation2 + $0x58] sm:$0xff]   ;;  %v1285_v16 = vld [vmem:[#allocation2 + $0x60] sm:$0xff]  }
  0x2b   :  { %1168 = vmatprep.subr.bf16.mxu1 %v1275_v6  ;;  %v1282_v13 = vld [vmem:[#allocation2 + $0x18] sm:$0xff]   ;;  %v1286_v17 = vld [vmem:[#allocation2 + $0x20] sm:$0xff]   ;;  %v1289_v20 = vld [vmem:[#allocation2 + $0x68] sm:$0xff]  }
  0x2c   :  { %1147 = vmatpush3.bf16.msra.mxu0 %v1274_v5  ;;  %v1283_v14 = vld [vmem:[#allocation2 + $0xd8] sm:$0xff]   ;;  %v1287_v18 = vld [vmem:[#allocation2 + $0xe0] sm:$0xff]   ;;  %v1290_v21 = vld [vmem:[#allocation2 + $0x28] sm:$0xff]  }
  0x2d   :  { %1148 = vmatprep.subr.bf16.mxu0 %v1277_v8  ;;  %v1284_v15 = vld [vmem:[#allocation2 + $0x98] sm:$0xff]   ;;  %v1288_v19 = vld [vmem:[#allocation2 + $0xa0] sm:$0xff]   ;;  %v1291_v22 = vld [vmem:[#allocation2 + $0xe8] sm:$0xff]  }
  0x2e   :  { %1169 = vmatpush3.bf16.msra.mxu1 %v1276_v7  ;;  %v1292_v23 = vld [vmem:[#allocation2 + $0xa8] sm:$0xff]   ;;  %v1293_v24 = vld [vmem:[#allocation2 + $0x70] sm:$0xff]   ;;  %v1297_v28 = vld [vmem:[#allocation2 + $0x78] sm:$0xff]  }
  0x2f   :  { %1170 = vmatprep.subr.bf16.mxu1 %v1279_v10  ;;  %v1294_v25 = vld [vmem:[#allocation2 + $0x30] sm:$0xff]   ;;  %v1298_v29 = vld [vmem:[#allocation2 + $0x38] sm:$0xff]   ;;  %v56_v31 = vld [vmem:[%s1597_s0] sm:$0xff] }
  0x30   :  { %1149 = vmatpush3.bf16.msra.mxu0 %v1278_v9  ;;  %v1295_v26 = vld [vmem:[#allocation2 + $0xf0] sm:$0xff]   ;;  %v1299_v30 = vld [vmem:[#allocation2 + $0xf8] sm:$0xff]   ;;  %v1048_v32 = vcombine.low %v56_v31, %v56_v31  ;;  %v1049_v33 = vcombine.high %v56_v31, %v56_v31  ;;  %v1303_v35 = vld [vmem:[#allocation2 + $0x140] sm:$0xff]  }
  0x31   :  { %1150 = vmatprep.subr.bf16.mxu0 %v1281_v12  ;;  %v1296_v27 = vld [vmem:[#allocation2 + $0xb0] sm:$0xff]   ;;  %v1302_v34 = vld [vmem:[#allocation2 + $0xb8] sm:$0xff]   ;;  %v57_v36 = vld [vmem:[%s1597_s0 + $0x8] sm:$0xff] }
  0x32   :  { %1171 = vmatpush3.bf16.msra.mxu1 %v1280_v11  ;;  %572 = vmatprep.mubr.bf16.mxu0 %v1049_v33  ;;  %v1050_v37 = vcombine.low %v57_v36, %v57_v36  ;;  %v1051_v38 = vcombine.high %v57_v36, %v57_v36  ;;  %v1306_v39 = vld [vmem:[#allocation2 + $0x100] sm:$0xff]   ;;  %v1308_v41 = vld [vmem:[#allocation2 + $0x148] sm:$0xff]   ;;  %v1311_v45 = vld [vmem:[#allocation2 + $0x150] sm:$0xff]  }
  0x33   :  { %1172 = vmatprep.subr.bf16.mxu1 %v1283_v14  ;;  %v1307_v40 = vld [vmem:[#allocation2 + $0x180] sm:$0xff]   ;;  %v1309_v43 = vld [vmem:[#allocation2 + $0x108] sm:$0xff]   ;;  %v1312_v46 = vld [vmem:[#allocation2 + $0x110] sm:$0xff]  }
  0x34   :  { %1151 = vmatpush3.bf16.msra.mxu0 %v1282_v13  ;;  %612 = vmatprep.mubr.bf16.mxu1 %v1051_v38  ;;  %v1310_v44 = vld [vmem:[#allocation2 + $0x188] sm:$0xff]   ;;  %v1313_v47 = vld [vmem:[#allocation2 + $0x190] sm:$0xff]   ;;  %v1314_v48 = vld [vmem:[#allocation2 + $0x158] sm:$0xff]  }
  0x35   :  { %1152 = vmatprep.subr.bf16.mxu0 %v1285_v16  ;;  %v1315_v49 = vld [vmem:[#allocation2 + $0x118] sm:$0xff]   ;;  %v1317_v50 = vld [vmem:[#allocation2 + $0x160] sm:$0xff]   ;;  %v1320_v53 = vld [vmem:[#allocation2 + $0x168] sm:$0xff]  }
  0x36   :  { %1173 = vmatpush3.bf16.msra.mxu1 %v1284_v15  ;;  %v1316_v51 = vld [vmem:[#allocation2 + $0x198] sm:$0xff]   ;;  %v1318_v52 = vld [vmem:[#allocation2 + $0x120] sm:$0xff]   ;;  %v1321_v55 = vld [vmem:[#allocation2 + $0x128] sm:$0xff]  }
  0x37   :  { %1174 = vmatprep.subr.bf16.mxu1 %v1287_v18  ;;  %v1319_v54 = vld [vmem:[#allocation2 + $0x1a0] sm:$0xff]   ;;  %v1323_v56 = vld [vmem:[#allocation2 + $0x170] sm:$0xff]   ;;  %v1322_v57 = vld [vmem:[#allocation2 + $0x1a8] sm:$0xff]  }
  0x38   :  { %1153 = vmatpush3.bf16.msra.mxu0 %v1286_v17  ;;  %v1324_v58 = vld [vmem:[#allocation2 + $0x130] sm:$0xff]   ;;  %v1326_v62 = vld [vmem:[#allocation2 + $0x178] sm:$0xff]   ;;  %v1332_v3 = vld [vmem:[%s1600_s3] ss:$8 sps:$4 sm:$0xff]  }
  0x39   :  { %1154 = vmatprep.subr.bf16.mxu0 %v1289_v20  ;;  %v58_v59 = vld [vmem:[%s1597_s0 + $0x10] sm:$0xff]  ;;  %v1327_v63 = vld [vmem:[#allocation2 + $0x138] sm:$0xff]   ;;  %v1334_v4 = vld [vmem:[%s1600_s3 + $0x4] ss:$8 sps:$4 sm:$0xff]  }
  0x3a   :  { %1175 = vmatpush3.bf16.msra.mxu1 %v1288_v19  ;;  %v1325_v60 = vld [vmem:[#allocation2 + $0x1b0] sm:$0xff]   ;;  %v1053_v61 = vcombine.high %v58_v59, %v58_v59  ;;  %v1330_v0 = vld [vmem:[#allocation2 + $0x1b8] sm:$0xff]   ;;  %v1052_v1 = vcombine.low %v58_v59, %v58_v59  ;;  %v1340_v7 = vld [vmem:[%s1600_s3 + $0x24] ss:$8 sps:$4 sm:$0xff]   ;;  %v1450_v19 = vmov 0  }
  0x3b   :  { %1176 = vmatprep.subr.bf16.mxu1 %v1291_v22  ;;  %v1331_v2 = vld [vmem:[%s1597_s0 + $0x18] ss:$0 sps:$4 sm:$0xff]   ;;  %v1337_v5 = vld [vmem:[%s1600_s3 + $0x14] ss:$8 sps:$4 sm:$0xff]   ;;  %v1338_v8 = vld [vmem:[%s1600_s3 + $0x20] ss:$8 sps:$4 sm:$0xff]  }
  0x3c   :  { %1155 = vmatpush3.bf16.msra.mxu0 %v1290_v21  ;;  %v1335_v6 = vld [vmem:[%s1600_s3 + $0x10] ss:$8 sps:$4 sm:$0xff]   ;;  %v1343_v9 = vld [vmem:[%s1600_s3 + $0x34] ss:$8 sps:$4 sm:$0xff]   ;;  %v1346_v11 = vld [vmem:[%s1600_s3 + $0x44] ss:$8 sps:$4 sm:$0xff]  }
  0x3d   :  { %1156 = vmatprep.subr.bf16.mxu0 %v1293_v24  ;;  %v1341_v10 = vld [vmem:[%s1600_s3 + $0x30] ss:$8 sps:$4 sm:$0xff]   ;;  %v1344_v12 = vld [vmem:[%s1600_s3 + $0x40] ss:$8 sps:$4 sm:$0xff]   ;;  %v1349_v13 = vld [vmem:[%s1600_s3 + $0x54] ss:$8 sps:$4 sm:$0xff]  }
  0x3e   :  { %1177 = vmatpush3.bf16.msra.mxu1 %v1292_v23  ;;  %v1347_v14 = vld [vmem:[%s1600_s3 + $0x50] ss:$8 sps:$4 sm:$0xff]   ;;  %v1352_v15 = vld [vmem:[%s1600_s3 + $0x64] ss:$8 sps:$4 sm:$0xff]   ;;  %v1350_v16 = vld [vmem:[%s1600_s3 + $0x60] ss:$8 sps:$4 sm:$0xff]  }
  0x3f   :  { %1178 = vmatprep.subr.bf16.mxu1 %v1295_v26  ;;  %v1355_v17 = vld [vmem:[%s1600_s3 + $0x74] ss:$8 sps:$4 sm:$0xff]   ;;  %v1353_v18 = vld [vmem:[%s1600_s3 + $0x70] ss:$8 sps:$4 sm:$0xff]   ;;  %v1356_v20 = vld [vmem:[#allocation5 + $0x40] sm:$0xff]  }
  0x40   :  { %1157 = vmatpush3.bf16.msra.mxu0 %v1294_v25  ;;  %v1357_v21 = vld [vmem:[#allocation5] sm:$0xff]   ;;  %v1358_v22 = vld [vmem:[#allocation5 + $0x48] sm:$0xff]   ;;  %v1360_v24 = vld [vmem:[#allocation5 + $0x50] sm:$0xff]  }
  0x41   :  { %1158 = vmatprep.subr.bf16.mxu0 %v1297_v28  ;;  %v1359_v23 = vld [vmem:[#allocation5 + $0x8] sm:$0xff]   ;;  %v1361_v25 = vld [vmem:[#allocation5 + $0x10] sm:$0xff]   ;;  %v1362_v26 = vld [vmem:[#allocation5 + $0x58] sm:$0xff]  }
  0x42   :  { %1179 = vmatpush3.bf16.msra.mxu1 %v1296_v27  ;;  %v1363_v27 = vld [vmem:[#allocation5 + $0x18] sm:$0xff]   ;;  %v1364_v28 = vld [vmem:[#allocation5 + $0x60] sm:$0xff]   ;;  %v1367_v31 = vld [vmem:[#allocation5 + $0x28] sm:$0xff]  }
  0x43   :  { %1180 = vmatprep.subr.bf16.mxu1 %v1299_v30  ;;  %v1366_v30 = vld [vmem:[#allocation5 + $0x68] sm:$0xff]   ;;  %v1047_v33 = vld [vmem:[%s1599_s2] ss:$0 sm:$0xff]  ;;  %v1369_v59 = vld [vmem:[#allocation5 + $0x30] sm:$0xff]  }
  0x44   :  { %1159 = vmatpush3.bf16.msra.mxu0 %v1298_v29  ;;  %v1365_v29 = vld [vmem:[#allocation5 + $0x20] sm:$0xff]  }
  0x45   :  { %1188 = vmatprep.subr.bf16.mxu0 %v1303_v35 }
  0x46   :  { %1181 = vmatpush3.bf16.msra.mxu1 %v1302_v34 }
  0x47   :  { %573 = vmatmul.mubr.bf16.vlgmr.msra.gmra.mrb[0].mxu0 %v1048_v32  ;;  %1241 = vmatprep.subr.bf16.mxu1 %v1448_v42 }
  0x48   :  { %1189 = vmatpush3.bf16.msra.mxu0 %v1306_v39  ;;  %652 = vmatprep.mubr.bf16.mxu0 %v1053_v61  ;;  %v1371_v61 = vld [vmem:[#allocation5 + $0x38] sm:$0xff]  }
  0x49   :  { %613 = vmatmul.mubr.bf16.vlgmr.msra.gmra.mrb[0].mxu1 %v1050_v37  ;;  %1190 = vmatprep.subr.bf16.mxu0 %v1308_v41 }
  0x4a   :  { %1242 = vmatpush3.bf16.msra.mxu1 %v1307_v40  ;;  %1257 = vmatprep.mubr.msk.bf16.mxu1 %vm1449_vm0, %v1448_v42 }
  0x4b   :  { %1243 = vmatprep.subr.bf16.mxu1 %v1448_v42 }
  0x4c   :  { %1191 = vmatpush3.bf16.msra.mxu0 %v1309_v43 }
  0x4d   :  { %1192 = vmatprep.subr.bf16.mxu0 %v1311_v45 }
  0x4e   :  { %1244 = vmatpush3.bf16.msra.mxu1 %v1310_v44 }
  0x4f   :  { %1245 = vmatprep.subr.bf16.mxu1 %v1448_v42 }
  0x50   :  { %1193 = vmatpush3.bf16.msra.mxu0 %v1312_v46 }
  0x51   :  { %1194 = vmatprep.subr.bf16.mxu0 %v1314_v48 }
  0x52   :  { %1246 = vmatpush3.bf16.msra.mxu1 %v1313_v47 }
  0x53   :  { %1247 = vmatprep.subr.bf16.mxu1 %v1448_v42 }
  0x54   :  { %1195 = vmatpush3.bf16.msra.mxu0 %v1315_v49 }
  0x55   :  { %1196 = vmatprep.subr.bf16.mxu0 %v1317_v50 }
  0x56   :  { %1248 = vmatpush3.bf16.msra.mxu1 %v1316_v51 }
  0x57   :  { %1249 = vmatprep.subr.bf16.mxu1 %v1448_v42 }
  0x58   :  { %1197 = vmatpush3.bf16.msra.mxu0 %v1318_v52 }
  0x59   :  { %1198 = vmatprep.subr.bf16.mxu0 %v1320_v53 }
  0x5a   :  { %1250 = vmatpush3.bf16.msra.mxu1 %v1319_v54 }
  0x5b   :  { %1251 = vmatprep.subr.bf16.mxu1 %v1448_v42 }
  0x5c   :  { %1199 = vmatpush3.bf16.msra.mxu0 %v1321_v55 }
  0x5d   :  { %1200 = vmatprep.subr.bf16.mxu0 %v1323_v56 }
  0x5e   :  { %1252 = vmatpush3.bf16.msra.mxu1 %v1322_v57 }
  0x5f   :  { %1253 = vmatprep.subr.bf16.mxu1 %v1448_v42 }
  0x60   :  { %1201 = vmatpush3.bf16.msra.mxu0 %v1324_v58  ;;  %v1368_v58 = vld [vmem:[#allocation5 + $0x70] sm:$0xff]  }
  0x61   :  { %1202 = vmatprep.subr.bf16.mxu0 %v1326_v62  ;;  %v720_v62 = vlaneseq }
  0x62   :  { %1254 = vmatpush3.bf16.msra.mxu1 %v1325_v60  ;;  %v1370_v60 = vld [vmem:[#allocation5 + $0x78] sm:$0xff]  }
  0x63   :  { %1255 = vmatprep.subr.bf16.mxu1 %v1448_v42 }
  0x64   :  { %1203 = vmatpush3.bf16.msra.mxu0 %v1327_v63  ;;  %v721_v63 = vshrl.u32 %v720_v62, 7 }
  0x65   :  { %810 = vmatprep.subr.bf16.mxu0 %v1334_v4 }
  0x66   :  { %1256 = vmatpush3.bf16.msra.mxu1 %v1330_v0  ;;  %v722_v0 = vsub.s32 0, %v721_v63 }
  0x67   :  { %653 = vmatmul.mubr.bf16.vlgmr.msra.gmra.mrb[4].mxu0 %v1052_v1  ;;  %1219 = vmatprep.subr.bf16.mxu1 %v1356_v20  ;;  %v718_v1 = vld [vmem:[%s1601_s4] sm:$0x3]  ;;  %s1451_s4 = smov [#allocation7]  }
  0x68   :  { %811 = vmatpush1.bf16.msra.mxu0 %v1332_v3  ;;  %842 = vmatprep.mubr.bf16.mxu0 %v1450_v19  ;;  %v723_v3 = vrot.slane %v718_v1, %v722_v0  ;;  %s1037_s19 = sshll.u32 %s1451_s4, 4  ;;  %s1038_s19 = int_to_ptr.vmem [resolvable:$true] %s1037_s19 }
  0x69   :  { %1258 = vmatmul.mubr.bf16.vlgmr.msra.gmra.mrb[4].mxu1 %v1331_v2  ;;  %812 = vmatprep.subr.bf16.mxu0 %v1337_v5  ;;  %v726_v2 = vsub.s32 1, %v721_v63  ;;  %s1416_s20 = scalar_lea.vmem %s1038_s19, 128  ;;  %p1421_p3 = scmp.lt.s32.totalorder %s1038_s19, %s1038_s19 }
  0x6a   :  { %1220 = vmatpush3.bf16.msra.mxu1 %v1357_v21  ;;  %p1417_p2 = scmp.ne.s32.totalorder %s1038_s19, %s1416_s20  ;;  %p1422_p4 = scmp.lt.s32.totalorder %s1416_s20, %s1416_s20 }
  0x6b   :  { %1221 = vmatprep.subr.bf16.mxu1 %v1358_v22  ;;  %v727_v4 = vrot.slane %v718_v1, %v726_v2 }
  0x6c   :  { %813 = vmatpush1.bf16.msra.mxu0 %v1335_v6  ;;  %p1423_p5 = por %p1422_p4, %p1421_p3 }
  0x6d   :  { %814 = vmatprep.subr.bf16.mxu0 %v1340_v7 }
  0x6e   :  { %1222 = vmatpush3.bf16.msra.mxu1 %v1359_v23  ;;  %p1424_p6 = pnand %p1423_p5, %p1417_p2 }
  0x6f   :  { %1223 = vmatprep.subr.bf16.mxu1 %v1360_v24 }
  0x70   :  { %815 = vmatpush1.bf16.msra.mxu0 %v1338_v8 }
  0x71   :  { %816 = vmatprep.subr.bf16.mxu0 %v1343_v9 }
  0x72   :  { %1224 = vmatpush3.bf16.msra.mxu1 %v1361_v25 }
  0x73   :  { %1225 = vmatprep.subr.bf16.mxu1 %v1362_v26 }
  0x74   :  { %817 = vmatpush1.bf16.msra.mxu0 %v1341_v10 }
  0x75   :  { %818 = vmatprep.subr.bf16.mxu0 %v1346_v11 }
  0x76   :  { %1226 = vmatpush3.bf16.msra.mxu1 %v1363_v27 }
  0x77   :  { %1227 = vmatprep.subr.bf16.mxu1 %v1364_v28 }
  0x78   :  { %819 = vmatpush1.bf16.msra.mxu0 %v1344_v12 }
  0x79   :  { %820 = vmatprep.subr.bf16.mxu0 %v1349_v13 }
  0x7a   :  { %1228 = vmatpush3.bf16.msra.mxu1 %v1365_v29 }
  0x7b   :  { %1229 = vmatprep.subr.bf16.mxu1 %v1366_v30 }
  0x7c   :  { %821 = vmatpush1.bf16.msra.mxu0 %v1347_v14 }
  0x7d   :  { %822 = vmatprep.subr.bf16.mxu0 %v1352_v15 }
  0x7e   :  { %1230 = vmatpush3.bf16.msra.mxu1 %v1367_v31 }
  0x7f   :  { %1231 = vmatprep.subr.bf16.mxu1 %v1368_v58 }
  0x80   :  { %823 = vmatpush1.bf16.msra.mxu0 %v1350_v16  ;;  %v1127_v16 = vld [vmem:[%s1603_s6] ss:$0 sm:$0xff] }
  0x81   :  { %824 = vmatprep.subr.bf16.mxu0 %v1355_v17 }
  0x82   :  { %1232 = vmatpush3.bf16.msra.mxu1 %v1369_v59 }
  0x83   :  { %1233 = vmatprep.subr.bf16.mxu1 %v1370_v60 }
  0x84   :  { %825 = vmatpush1.bf16.msra.mxu0 %v1353_v18 }
  0x86   :  { %1234 = vmatpush3.bf16.msra.mxu1 %v1371_v61 }
 0x11a   :  { %v1160_v32 = vpop.f32.mrb[0].mxu0 }
 0x11b   :  { %v1161_v34 = vpop.f32.mrb[1].mxu0 }
 0x11c   :  { %v1162_v35 = vadd.f32 %v1161_v34, %v1160_v32  ;;  %v1163_v36 = vpop.f32.mrb[2].mxu0  ;;  %v1182_v37 = vpop.f32.mrb[0].mxu1 }
 0x11d   :  { %v1164_v38 = vpop.f32.mrb[3].mxu0  ;;  %v1183_v39 = vpop.f32.mrb[1].mxu1 }
 0x11e   :  { %v575_v40 = vadd.f32 %v1162_v35, %v1047_v33  ;;  %v1184_v41 = vadd.f32 %v1183_v39, %v1182_v37  ;;  %v1185_v42 = vpop.f32.mrb[2].mxu1 }
 0x11f   :  { %v1186_v43 = vpop.f32.mrb[3].mxu1 }
 0x120   :  { %v615_v44 = vadd.f32 %v1184_v41, %v575_v40 }
 0x13a   :  { %v1204_v45 = vpop.f32.mrb[4].mxu0 }
 0x13b   :  { %v1205_v46 = vpop.f32.mrb[5].mxu0 }
 0x13c   :  { %v1206_v47 = vadd.f32 %v1205_v46, %v1204_v45  ;;  %v1207_v48 = vpop.f32.mrb[6].mxu0  ;;  %v694_v49 = vpop.f32.mrb[4].mxu1 }
 0x13d   :  { %v1208_v50 = vpop.f32.mrb[7].mxu0  ;;  %v1259_v51 = vpop.f32.mrb[5].mxu1 }
 0x13e   :  { %v655_v52 = vadd.f32 %v1206_v47, %v615_v44  ;;  %v697_v53 = vpop.f32.mrb[6].mxu1 }
 0x13f   :  { %v1260_v54 = vpop.f32.mrb[7].mxu1 }
 0x140   :  { %v695_v55 = vadd.f32 %v694_v49, %v655_v52 }
 0x142   :  { %v700_v56 = vmax.f32 %v695_v55, 0.0 }
 0x144   :  { %v701_v57 = vpack.c.bf16 %v700_v56, %v700_v56 }
 0x146   :  { %843 = vmatmul.mubr.bf16.vlgmr.msra.gmra.mrb[8].mxu0 %v701_v57 }
 0x219   :  { %v844_v5 = vpop.f32.mrb[8].mxu0 }
 0x21a   :  { %v845_v6 = vadd.f32 %v844_v5, %v723_v3  ;;  %v846_v7 = vpop.f32.mrb[9].mxu0 }
 0x21b   :  { %v847_v8 = vadd.f32 %v846_v7, %v727_v4  ;;  %v848_v9 = vpop.f32.mrb[10].mxu0 }
 0x21c   :  { %v851_v10 = vmax.f32 %v845_v6, 0.0  ;;  %v849_v11 = vpop.f32.mrb[11].mxu0 }
 0x21d   :  { %v852_v12 = vmax.f32 %v847_v8, 0.0 }
 0x21e   :  { %v853_v14 = vpack.c.bf16 %v851_v10, %v851_v10 }
 0x21f   :  { %v854_v13 = vpack.c.bf16 %v852_v12, %v852_v12 }
 0x221   :  { %1022 = vmatprep.mubr.bf16.mxu1 %v854_v13 }
 0x222   :  { %1023 = vmatmul.mubr.bf16.vlgmr.msra.gmra.mrb[8].mxu1 %v853_v14 }
 0x2f5   :  { %v1235_v15 = vpop.f32.mrb[8].mxu1 }
 0x2f6   :  { %v1236_v17 = vpop.f32.mrb[9].mxu1 }
 0x2f7   :  { %v1237_v18 = vadd.f32 %v1236_v17, %v1235_v15  ;;  %v1238_v19 = vpop.f32.mrb[10].mxu1 }
 0x2f8   :  { %v1239_v20 = vpop.f32.mrb[11].mxu1 }
 0x2f9   :  { %v1025_v21 = vadd.f32 %v1237_v18, %v1127_v16 }
 0x2fb   :  { %1030 = vst [vmem:[#allocation7] sm:$0xff] %v1025_v21 }
 0x2fc   :  { %1427 = shalt.err (!%p1424_p6)
}
 0x2fd   :  { %s1428_s6 = scalar_lea.hbm %s1604_s7, 128 }
 0x2fe   :  { %p1429_p7 = scmp.ne.s32.totalorder %s1604_s7, %s1428_s6  ;;  %p1432_p8 = scmp.lt.u32.totalorder %s1428_s6, %s1604_s7 }
 0x300   :  { %p1434_p9 = pnand %p1432_p8, %p1429_p7 }
 0x302   :  { %1437 = shalt.err (!%p1434_p9)
}
 0x303   :  { %1040 = dma.vmem_to_hbm [thread:$0]  %s1038_s19, 128, %s1604_s7, [#allocation4]  }
 0x304   :  { %1442 = dma.done.wait [#allocation4], 128  }
 0x305   :  { %1443 = vsyncadd [#allocation4], 4294967168 }
 0x306   :  { %1044 = vsyncpa [#allocation3], 1 }
 0x307   :  { %1045 = vsyncpa [#allocation6], 1 }
 0x308   :  { %1046 = vsyncpa [#allocation4], 1 }

</bundles_post_ra>
